<compile_context>
chip_gen: v7x
topology: tpu7x:2x2x1
jax: 0.10.0
libtpu: 0.0.40
codegen_flags: <defaults>
</compile_context>

<pallas_src>
import functools

import jax
import jax.numpy as jnp
import numpy as np
from jax.experimental import pallas as pl
from jax.experimental.pallas import tpu as pltpu


def conv_relu_kernel(xa_ref, xh0_ref, xh1_ref, w_ref, b_ref, o_ref, col_ref,
                     *, tile_h, W, Cin, Cout):
    # xa_ref : (tile_h, W+2, Cin)   bf16  main slab of the zero-padded image
    # xh0_ref: (1, W+2, Cin)        bf16  halo row (padded row t*tile_h+tile_h)
    # xh1_ref: (1, W+2, Cin)        bf16  halo row (padded row t*tile_h+tile_h+1)
    # w_ref  : (3, 3*Cin, Cout)     bf16  weights, layout [kh, kw*Cin + ci, co]
    # b_ref  : (1, Cout)            f32   bias
    # o_ref  : (tile_h, W, Cout)          output row slab (real Cout, no pad)
    # col_ref: (tile_h+2, W, 3*Cin) bf16  VMEM scratch: kw-im2col of the slab

    # Build the kw-im2col once per slab (3 shifted copies of the slab instead
    # of 9 per-tap slice+reshape relayouts).  Stores are full-lane aligned.
    col_ref[0:tile_h] = jnp.concatenate(
        [xa_ref[:, kw:kw + W, :] for kw in range(3)], axis=-1)
    col_ref[tile_h:tile_h + 1] = jnp.concatenate(
        [xh0_ref[:, kw:kw + W, :] for kw in range(3)], axis=-1)
    col_ref[tile_h + 1:tile_h + 2] = jnp.concatenate(
        [xh1_ref[:, kw:kw + W, :] for kw in range(3)], axis=-1)

    # 3 accumulating matmuls with K = 3*Cin, f32 accumulation; accumulator is
    # seeded with the broadcast bias (no zero-fill pass, no separate bias add).
    acc = b_ref[...].astype(jnp.float32)                      # (1, Cout)
    for kh in range(3):
        lhs = col_ref[kh:kh + tile_h, :, :].reshape(tile_h * W, 3 * Cin)
        acc = acc + jnp.dot(lhs, w_ref[kh],
                            preferred_element_type=jnp.float32)

    out = jnp.maximum(acc, 0.0)                                # f32 ReLU
    o_ref[...] = out.reshape(tile_h, W, Cout).astype(o_ref.dtype)


def _divisors(n):
    return [d for d in range(1, n + 1) if n % d == 0]


def _vmem_estimate(tile_h, W, Cin, Cout, out_itemsize):
    bf16 = 2
    xa = 2 * tile_h * (W + 2) * Cin * bf16          # main slab, double-buffered
    halo = 2 * 2 * (W + 2) * Cin * bf16             # two 1-row halo blocks
    wgt = 2 * (9 * Cin * Cout * bf16 + 4 * Cout)    # resident weights + bias
    outb = 2 * tile_h * W * Cout * out_itemsize     # output block, double-buffered
    col = (tile_h + 2) * W * 3 * Cin * bf16         # im2col scratch
    acc = tile_h * W * Cout * 4                     # f32 accumulator live value
    return xa + halo + wgt + outb + col + acc


def _pick_tile_h(H, W, Cin, Cout, out_itemsize, budget_bytes):
    fits = [d for d in _divisors(H)
            if _vmem_estimate(d, W, Cin, Cout, out_itemsize) <= budget_bytes]
    if not fits:
        return 1
    # Prefer sublane-aligned row-slabs, and >= 2 slabs so a parallel T axis can
    # feed both v7x TensorCores even at batch 1.
    for pred in ((lambda d: (d * W) % 8 == 0 and H // d >= 2),
                 (lambda d: (d * W) % 8 == 0),
                 (lambda d: True)):
        good = [d for d in fits if pred(d)]
        if good:
            return max(good)
    return max(fits)


def conv_relu(x_nchw, w_oihw, bias, *, tile_h=None,
              vmem_budget_bytes=20 * 1024 * 1024):
    """Equivalent of ConvRelu.forward: ReLU(Conv2d(x, 3x3, padding=1))."""
    N, Cin, H, W = x_nchw.shape
    Cout = w_oihw.shape[0]
    out_dtype = x_nchw.dtype
    out_itemsize = jnp.dtype(out_dtype).itemsize

    if tile_h is None:
        tile_h = _pick_tile_h(H, W, Cin, Cout, out_itemsize, vmem_budget_bytes)
    assert H % tile_h == 0, "tile_h must divide H"
    T = H // tile_h

    # ---- glue: NCHW -> NHWC (bf16), zero-pad spatially ----
    # TODO(synk): keep activations NHWC/bf16 end-to-end so this transpose and
    # the epilogue transpose disappear.
    x = jnp.transpose(x_nchw, (0, 2, 3, 1)).astype(jnp.bfloat16)   # (N, H, W, Cin)
    xp = jnp.pad(x, ((0, 0), (1, 1), (1, 1), (0, 0)))              # (N, H+2, W+2, Cin)

    # weights: (Cout, Cin, 3, 3) -> (kh, kw, Cin, Cout) -> (3, 3*Cin, Cout)
    # so each matmul packs the three kw taps into the contraction (K = 3*Cin).
    w = jnp.transpose(w_oihw, (2, 3, 1, 0)).reshape(3, 3 * Cin, Cout)
    w = w.astype(jnp.bfloat16)
    b = bias.astype(jnp.float32).reshape(1, Cout)

    kernel = functools.partial(conv_relu_kernel, tile_h=tile_h, W=W,
                               Cin=Cin, Cout=Cout)

    # The padded image is passed three times: a tile_h-row main slab plus the
    # two single-row bottom halo rows.  All three use plain Blocked BlockSpecs,
    # so per-step VMEM is bounded by tile_h and fetches pipeline normally.
    main_spec = pl.BlockSpec((pl.Squeezed(), tile_h, W + 2, Cin),
                             lambda n, t: (n, t, 0, 0))
    halo0_spec = pl.BlockSpec((pl.Squeezed(), 1, W + 2, Cin),
                              lambda n, t: (n, (t + 1) * tile_h, 0, 0))
    halo1_spec = pl.BlockSpec((pl.Squeezed(), 1, W + 2, Cin),
                              lambda n, t: (n, (t + 1) * tile_h + 1, 0, 0))

    out = pl.pallas_call(
        kernel,
        out_shape=jax.ShapeDtypeStruct((N, H, W, Cout), out_dtype),
        grid_spec=pltpu.PrefetchScalarGridSpec(
            num_scalar_prefetch=0,
            grid=(N, T),
            in_specs=[
                main_spec, halo0_spec, halo1_spec,
                # weights / bias: constant block index -> resident in VMEM.
                # TODO(synk): pipeline_mode=pl.Buffered(1) to single-buffer.
                pl.BlockSpec((3, 3 * Cin, Cout), lambda n, t: (0, 0, 0)),
                pl.BlockSpec((1, Cout), lambda n, t: (0, 0)),
            ],
            out_specs=pl.BlockSpec((pl.Squeezed(), tile_h, W, Cout),
                                   lambda n, t: (n, t, 0, 0)),
            scratch_shapes=[
                pltpu.VMEM((tile_h + 2, W, 3 * Cin), jnp.bfloat16),
            ],
        ),
        compiler_params=pltpu.CompilerParams(
            dimension_semantics=("parallel", "parallel"),
            vmem_limit_bytes=48 * 1024 * 1024),
    )(xp, xp, xp, w, b)

    # glue: NHWC -> NCHW to match the torch API (no Cout padding to strip).
    return jnp.transpose(out, (0, 3, 1, 2))


def reference_conv_relu(x_nchw, w_oihw, bias):
    out = jax.lax.conv_general_dilated(
        x_nchw, w_oihw, window_strides=(1, 1), padding=((1, 1), (1, 1)),
        dimension_numbers=("NCHW", "OIHW", "NCHW"))
    out = out + bias.reshape(1, -1, 1, 1)
    return jnp.maximum(out, 0.0)


if __name__ == "__main__":
    key = jax.random.PRNGKey(0)
    kx, kw, kb = jax.random.split(key, 3)

    N, Cin, H, W = 2, 4, 16, 16
    Cout = 8

    x = jax.random.normal(kx, (N, Cin, H, W), dtype=jnp.float32)

    # PyTorch Conv2d default init: U(-k, k), k = 1/sqrt(Cin*3*3)
    k = 1.0 / np.sqrt(Cin * 3 * 3)
    weight = jax.random.uniform(kw, (Cout, Cin, 3, 3), minval=-k, maxval=k,
                                dtype=jnp.float32)
    bias = jax.random.uniform(kb, (Cout,), minval=-k, maxval=k, dtype=jnp.float32)

    # tile_h=8 -> grid (N=2, T=2): exercises multi-slab tiling + bottom halo rows.
    out = jax.block_until_ready(conv_relu(x, weight, bias, tile_h=8))
    ref = jax.block_until_ready(reference_conv_relu(x, weight, bias))

    # bf16 MXU inputs with f32 accumulation -> relaxed tolerance vs f32 reference.
    np.testing.assert_allclose(np.asarray(out), np.asarray(ref),
                               rtol=5e-2, atol=5e-2)

    print("KERNEL_OK")
</pallas_src>

<mosaic_0001>
module attributes {stable_mosaic.version = 11 : i64} {
  func.func @conv_relu_kernel(%arg0: i32, %arg1: i32, %arg2: memref<1x8x18x4xbf16, #tpu.memory_space<vmem>>, %arg3: memref<1x1x18x4xbf16, #tpu.memory_space<vmem>>, %arg4: memref<1x1x18x4xbf16, #tpu.memory_space<vmem>>, %arg5: memref<3x12x8xbf16, #tpu.memory_space<vmem>>, %arg6: memref<1x8xf32, #tpu.memory_space<vmem>>, %arg7: memref<1x8x16x8xf32, #tpu.memory_space<vmem>>, %arg8: memref<10x16x12xbf16, #tpu.memory_space<vmem>>) attributes {dimension_semantics = [#tpu.dimension_semantics<parallel>, #tpu.dimension_semantics<parallel>], iteration_bounds = array<i64: 2, 2>, scalar_prefetch = 0 : i64, scratch_operands = 1 : i64, tpu.core_type = #tpu.core_type<tc>, window_params = [{transform_indices = @transform_0, window_bounds = array<i64: 1, 8, 18, 4>}, {transform_indices = @transform_1, window_bounds = array<i64: 1, 1, 18, 4>}, {transform_indices = @transform_2, window_bounds = array<i64: 1, 1, 18, 4>}, {pipeline_mode = #tpu.pipeline_mode<synchronous>, transform_indices = @transform_3, window_bounds = array<i64: 3, 12, 8>}, {pipeline_mode = #tpu.pipeline_mode<synchronous>, transform_indices = @transform_4, window_bounds = array<i64: 1, 8>}, {transform_indices = @transform_5, window_bounds = array<i64: 1, 8, 16, 8>}]} {
    %c0 = arith.constant 0 : index
    %c0_0 = arith.constant 0 : index
    %c0_1 = arith.constant 0 : index
    %c0_2 = arith.constant 0 : index
    %0 = vector.load %arg2[%c0, %c0_0, %c0_1, %c0_2] : memref<1x8x18x4xbf16, #tpu.memory_space<vmem>>, vector<1x8x16x4xbf16>
    %1 = vector.shape_cast %0 : vector<1x8x16x4xbf16> to vector<8x16x4xbf16>
    %c0_3 = arith.constant 0 : index
    %c0_4 = arith.constant 0 : index
    %c1 = arith.constant 1 : index
    %c0_5 = arith.constant 0 : index
    %2 = vector.load %arg2[%c0_3, %c0_4, %c1, %c0_5] : memref<1x8x18x4xbf16, #tpu.memory_space<vmem>>, vector<1x8x16x4xbf16>
    %3 = vector.shape_cast %2 : vector<1x8x16x4xbf16> to vector<8x16x4xbf16>
    %c0_6 = arith.constant 0 : index
    %c0_7 = arith.constant 0 : index
    %c2 = arith.constant 2 : index
    %c0_8 = arith.constant 0 : index
    %4 = vector.load %arg2[%c0_6, %c0_7, %c2, %c0_8] : memref<1x8x18x4xbf16, #tpu.memory_space<vmem>>, vector<1x8x16x4xbf16>
    %5 = vector.shape_cast %4 : vector<1x8x16x4xbf16> to vector<8x16x4xbf16>
    %6 = tpu.concatenate %1, %3, %5 in 2 : vector<8x16x4xbf16>, vector<8x16x4xbf16>, vector<8x16x4xbf16> -> vector<8x16x12xbf16>
    %c0_9 = arith.constant 0 : index
    %c0_10 = arith.constant 0 : index
    %c0_11 = arith.constant 0 : index
    %7 = vector.load %arg8[%c0_9, %c0_10, %c0_11] : memref<10x16x12xbf16, #tpu.memory_space<vmem>>, vector<8x16x12xbf16>
    tpu.vector_store %arg8[%c0_9, %c0_10, %c0_11], %6 {strides = array<i32>} : memref<10x16x12xbf16, #tpu.memory_space<vmem>>, vector<8x16x12xbf16>,
    %c0_12 = arith.constant 0 : index
    %c0_13 = arith.constant 0 : index
    %c0_14 = arith.constant 0 : index
    %c0_15 = arith.constant 0 : index
    %8 = vector.load %arg3[%c0_12, %c0_13, %c0_14, %c0_15] : memref<1x1x18x4xbf16, #tpu.memory_space<vmem>>, vector<1x1x16x4xbf16>
    %9 = vector.shape_cast %8 : vector<1x1x16x4xbf16> to vector<1x16x4xbf16>
    %c0_16 = arith.constant 0 : index
    %c0_17 = arith.constant 0 : index
    %c1_18 = arith.constant 1 : index
    %c0_19 = arith.constant 0 : index
    %10 = vector.load %arg3[%c0_16, %c0_17, %c1_18, %c0_19] : memref<1x1x18x4xbf16, #tpu.memory_space<vmem>>, vector<1x1x16x4xbf16>
    %11 = vector.shape_cast %10 : vector<1x1x16x4xbf16> to vector<1x16x4xbf16>
    %c0_20 = arith.constant 0 : index
    %c0_21 = arith.constant 0 : index
    %c2_22 = arith.constant 2 : index
    %c0_23 = arith.constant 0 : index
    %12 = vector.load %arg3[%c0_20, %c0_21, %c2_22, %c0_23] : memref<1x1x18x4xbf16, #tpu.memory_space<vmem>>, vector<1x1x16x4xbf16>
    %13 = vector.shape_cast %12 : vector<1x1x16x4xbf16> to vector<1x16x4xbf16>
    %14 = tpu.concatenate %9, %11, %13 in 2 : vector<1x16x4xbf16>, vector<1x16x4xbf16>, vector<1x16x4xbf16> -> vector<1x16x12xbf16>
    %c8 = arith.constant 8 : index
    %c0_24 = arith.constant 0 : index
    %c0_25 = arith.constant 0 : index
    %15 = vector.load %arg8[%c8, %c0_24, %c0_25] : memref<10x16x12xbf16, #tpu.memory_space<vmem>>, vector<1x16x12xbf16>
    tpu.vector_store %arg8[%c8, %c0_24, %c0_25], %14 {strides = array<i32>} : memref<10x16x12xbf16, #tpu.memory_space<vmem>>, vector<1x16x12xbf16>,
    %c0_26 = arith.constant 0 : index
    %c0_27 = arith.constant 0 : index
    %c0_28 = arith.constant 0 : index
    %c0_29 = arith.constant 0 : index
    %16 = vector.load %arg4[%c0_26, %c0_27, %c0_28, %c0_29] : memref<1x1x18x4xbf16, #tpu.memory_space<vmem>>, vector<1x1x16x4xbf16>
    %17 = vector.shape_cast %16 : vector<1x1x16x4xbf16> to vector<1x16x4xbf16>
    %c0_30 = arith.constant 0 : index
    %c0_31 = arith.constant 0 : index
    %c1_32 = arith.constant 1 : index
    %c0_33 = arith.constant 0 : index
    %18 = vector.load %arg4[%c0_30, %c0_31, %c1_32, %c0_33] : memref<1x1x18x4xbf16, #tpu.memory_space<vmem>>, vector<1x1x16x4xbf16>
    %19 = vector.shape_cast %18 : vector<1x1x16x4xbf16> to vector<1x16x4xbf16>
    %c0_34 = arith.constant 0 : index
    %c0_35 = arith.constant 0 : index
    %c2_36 = arith.constant 2 : index
    %c0_37 = arith.constant 0 : index
    %20 = vector.load %arg4[%c0_34, %c0_35, %c2_36, %c0_37] : memref<1x1x18x4xbf16, #tpu.memory_space<vmem>>, vector<1x1x16x4xbf16>
    %21 = vector.shape_cast %20 : vector<1x1x16x4xbf16> to vector<1x16x4xbf16>
    %22 = tpu.concatenate %17, %19, %21 in 2 : vector<1x16x4xbf16>, vector<1x16x4xbf16>, vector<1x16x4xbf16> -> vector<1x16x12xbf16>
    %c9 = arith.constant 9 : index
    %c0_38 = arith.constant 0 : index
    %c0_39 = arith.constant 0 : index
    %23 = vector.load %arg8[%c9, %c0_38, %c0_39] : memref<10x16x12xbf16, #tpu.memory_space<vmem>>, vector<1x16x12xbf16>
    tpu.vector_store %arg8[%c9, %c0_38, %c0_39], %22 {strides = array<i32>} : memref<10x16x12xbf16, #tpu.memory_space<vmem>>, vector<1x16x12xbf16>,
    %c0_40 = arith.constant 0 : index
    %c0_41 = arith.constant 0 : index
    %24 = vector.load %arg6[%c0_40, %c0_41] : memref<1x8xf32, #tpu.memory_space<vmem>>, vector<1x8xf32>
    %c0_42 = arith.constant 0 : index
    %c0_43 = arith.constant 0 : index
    %c0_44 = arith.constant 0 : index
    %25 = vector.load %arg8[%c0_42, %c0_43, %c0_44] : memref<10x16x12xbf16, #tpu.memory_space<vmem>>, vector<8x16x12xbf16>
    %26 = vector.shape_cast %25 : vector<8x16x12xbf16> to vector<128x12xbf16>
    %c0_45 = arith.constant 0 : index
    %c0_46 = arith.constant 0 : index
    %c0_47 = arith.constant 0 : index
    %27 = vector.load %arg5[%c0_45, %c0_46, %c0_47] : memref<3x12x8xbf16, #tpu.memory_space<vmem>>, vector<1x12x8xbf16>
    %28 = vector.shape_cast %27 : vector<1x12x8xbf16> to vector<12x8xbf16>
    %cst = arith.constant dense<0.000000e+00> : vector<128x8xf32>
    %29 = tpu.matmul %26, %28, %cst {dimension_numbers = #tpu.dot_dimension_numbers<[1], [0], [0], [1], [0, 0, 1, 1], [], []>} : vector<128x12xbf16>, vector<12x8xbf16>, vector<128x8xf32> -> vector<128x8xf32>
    %30 = vector.broadcast %24 : vector<1x8xf32> to vector<128x8xf32>
    %31 = arith.addf %30, %29 : vector<128x8xf32>
    %c1_48 = arith.constant 1 : index
    %c0_49 = arith.constant 0 : index
    %c0_50 = arith.constant 0 : index
    %32 = vector.load %arg8[%c1_48, %c0_49, %c0_50] : memref<10x16x12xbf16, #tpu.memory_space<vmem>>, vector<8x16x12xbf16>
    %33 = vector.shape_cast %32 : vector<8x16x12xbf16> to vector<128x12xbf16>
    %c1_51 = arith.constant 1 : index
    %c0_52 = arith.constant 0 : index
    %c0_53 = arith.constant 0 : index
    %34 = vector.load %arg5[%c1_51, %c0_52, %c0_53] : memref<3x12x8xbf16, #tpu.memory_space<vmem>>, vector<1x12x8xbf16>
    %35 = vector.shape_cast %34 : vector<1x12x8xbf16> to vector<12x8xbf16>
    %cst_54 = arith.constant dense<0.000000e+00> : vector<128x8xf32>
    %36 = tpu.matmul %33, %35, %cst_54 {dimension_numbers = #tpu.dot_dimension_numbers<[1], [0], [0], [1], [0, 0, 1, 1], [], []>} : vector<128x12xbf16>, vector<12x8xbf16>, vector<128x8xf32> -> vector<128x8xf32>
    %37 = arith.addf %31, %36 : vector<128x8xf32>
    %c2_55 = arith.constant 2 : index
    %c0_56 = arith.constant 0 : index
    %c0_57 = arith.constant 0 : index
    %38 = vector.load %arg8[%c2_55, %c0_56, %c0_57] : memref<10x16x12xbf16, #tpu.memory_space<vmem>>, vector<8x16x12xbf16>
    %39 = vector.shape_cast %38 : vector<8x16x12xbf16> to vector<128x12xbf16>
    %c2_58 = arith.constant 2 : index
    %c0_59 = arith.constant 0 : index
    %c0_60 = arith.constant 0 : index
    %40 = vector.load %arg5[%c2_58, %c0_59, %c0_60] : memref<3x12x8xbf16, #tpu.memory_space<vmem>>, vector<1x12x8xbf16>
    %41 = vector.shape_cast %40 : vector<1x12x8xbf16> to vector<12x8xbf16>
    %cst_61 = arith.constant dense<0.000000e+00> : vector<128x8xf32>
    %42 = tpu.matmul %39, %41, %cst_61 {dimension_numbers = #tpu.dot_dimension_numbers<[1], [0], [0], [1], [0, 0, 1, 1], [], []>} : vector<128x12xbf16>, vector<12x8xbf16>, vector<128x8xf32> -> vector<128x8xf32>
    %43 = arith.addf %37, %42 : vector<128x8xf32>
    %cst_62 = arith.constant 0.000000e+00 : f32
    %44 = vector.broadcast %cst_62 : f32 to vector<128x8xf32>
    %45 = arith.maximumf %43, %44 : vector<128x8xf32>
    %46 = vector.shape_cast %45 : vector<128x8xf32> to vector<8x16x8xf32>
    %c0_63 = arith.constant 0 : index
    %c0_64 = arith.constant 0 : index
    %c0_65 = arith.constant 0 : index
    %c0_66 = arith.constant 0 : index
    %47 = vector.load %arg7[%c0_63, %c0_64, %c0_65, %c0_66] : memref<1x8x16x8xf32, #tpu.memory_space<vmem>>, vector<1x8x16x8xf32>
    %48 = vector.shape_cast %47 : vector<1x8x16x8xf32> to vector<8x16x8xf32>
    %49 = vector.shape_cast %46 : vector<8x16x8xf32> to vector<1x8x16x8xf32>
    tpu.vector_store %arg7[%c0_63, %c0_64, %c0_65, %c0_66], %49 {strides = array<i32>} : memref<1x8x16x8xf32, #tpu.memory_space<vmem>>, vector<1x8x16x8xf32>,
    return
  }
  func.func @transform_0(%arg0: i32, %arg1: i32) -> (i32, i32, i32, i32) {
    %c0_i32 = arith.constant 0 : i32
    %c0_i32_0 = arith.constant 0 : i32
    %c0_i32_1 = arith.constant 0 : i32
    return %arg0, %arg1, %c0_i32, %c0_i32_0 : i32, i32, i32, i32
  }
  func.func @transform_1(%arg0: i32, %arg1: i32) -> (i32, i32, i32, i32) {
    %c1_i32 = arith.constant 1 : i32
    %0 = arith.addi %arg1, %c1_i32 : i32
    %c8_i32 = arith.constant 8 : i32
    %1 = arith.muli %0, %c8_i32 : i32
    %c0_i32 = arith.constant 0 : i32
    %c0_i32_0 = arith.constant 0 : i32
    %c0_i32_1 = arith.constant 0 : i32
    return %arg0, %1, %c0_i32, %c0_i32_0 : i32, i32, i32, i32
  }
  func.func @transform_2(%arg0: i32, %arg1: i32) -> (i32, i32, i32, i32) {
    %c1_i32 = arith.constant 1 : i32
    %0 = arith.addi %arg1, %c1_i32 : i32
    %c8_i32 = arith.constant 8 : i32
    %1 = arith.muli %0, %c8_i32 : i32
    %c1_i32_0 = arith.constant 1 : i32
    %2 = arith.addi %1, %c1_i32_0 : i32
    %c0_i32 = arith.constant 0 : i32
    %c0_i32_1 = arith.constant 0 : i32
    %c0_i32_2 = arith.constant 0 : i32
    return %arg0, %2, %c0_i32, %c0_i32_1 : i32, i32, i32, i32
  }
  func.func @transform_3(%arg0: i32, %arg1: i32) -> (i32, i32, i32) {
    %c0_i32 = arith.constant 0 : i32
    %c0_i32_0 = arith.constant 0 : i32
    %c0_i32_1 = arith.constant 0 : i32
    %c0_i32_2 = arith.constant 0 : i32
    return %c0_i32, %c0_i32_0, %c0_i32_1 : i32, i32, i32
  }
  func.func @transform_4(%arg0: i32, %arg1: i32) -> (i32, i32) {
    %c0_i32 = arith.constant 0 : i32
    %c0_i32_0 = arith.constant 0 : i32
    %c0_i32_1 = arith.constant 0 : i32
    return %c0_i32, %c0_i32_0 : i32, i32
  }
  func.func @transform_5(%arg0: i32, %arg1: i32) -> (i32, i32, i32, i32) {
    %c0_i32 = arith.constant 0 : i32
    %c0_i32_0 = arith.constant 0 : i32
    %c0_i32_1 = arith.constant 0 : i32
    return %arg0, %arg1, %c0_i32, %c0_i32_0 : i32, i32, i32, i32
  }
}

</mosaic_0001>

<bundles_post_ra>
// kernel: tpu_custom_call.1
= control target key start
LH: loop header
LB: loop body
LE: loop exit
PB: predicated region body
PF: predicated region fallthrough
CT: control target
= control target key end

     0   :  { %s1836_s18 = smov 0   ;;  %s1838_s19 = smov 0   ;;  %s2207_s0 = inlined_call_operand.vmem [shape: bf16[2,18,18,4], index: 0, kind: input, shape index: {}]   ;;  %s2208_s1 = inlined_call_operand.vmem [shape: bf16[2,18,18,4], index: 1, kind: input, shape index: {}]   ;;  %s2209_s2 = inlined_call_operand.vmem [shape: bf16[2,18,18,4], index: 2, kind: input, shape index: {}]   ;;  %s2210_s3 = inlined_call_operand.vmem [shape: bf16[3,12,8], index: 3, kind: input, shape index: {}]   ;;  %s2211_s4 = inlined_call_operand.vmem [shape: f32[1,8], index: 4, kind: input, shape index: {}]   ;;  %s2212_s5 = inlined_call_operand.vmem [shape: f32[2,16,16,8], index: 5, kind: output, shape index: {}]  }
   0x1   :  { %s1840_s20 = smov 0   ;;  %s1842_s21 = smov 0  }
   0x2   :  { %s1844_s22 = smov 0  }
   0x3 LB: > { %s24_s23 = sadd.s32 1, %s1794_s20  ;;  %s27_s24 = sadd.s32 1, %s1798_s21  ;;  %s1802_s22 = sphi %s1844_s22, %s15_s22   ;;  %s1798_s21 = sphi %s1842_s21, %s2217_s21   ;;  %s1794_s20 = sphi %s1840_s20, %s2216_s20   ;;  %s1790_s19 = sphi %s1838_s19, %s2215_s19   ;;  %s1786_s18 = sphi %s1836_s18, %s2214_s18  }
   0x4   : > { %p25_p0 = scmp.ge.s32.totalorder %s24_s23, 2  ;;  %p1463_p1 = scmp.ge.s32.totalorder %s1802_s22, 1 }
   0x5   : > { %p271_p2 = scmp.lt.s32.totalorder %s1802_s22, 5 }
   0x6   : > { %s2219_s23 = smov (%p25_p0, %s24_s23), 0  ;;  %s2221_s24 = smov (!%p25_p0, %s27_s24), %s1798_s21 }
   0x7   : > { %p272_p3 = pnand %p1463_p1, %p271_p2  ;;  %p29_p4 = scmp.ge.s32.totalorder %s2221_s24, 2 }
   0x8   : > { %s1866_s25 = sshll.u32 (!%p272_p3), %s1786_s18, 3  ;;  %p343_p5 = scmp.lt.s32.totalorder (!%p272_p3), %s1790_s19, 1  ;;  %vm631_vm0 = vcmask (!%p272_p3), 1046528   ;;  %vm494_vm1 = vsmask.f32 (!%p272_p3), 7424  ;;  %vm845_vm2 = vcmask (!%p272_p3), 1045504  }
   0x9   : > { %s2223_s24 = smov (%p29_p4, %s2221_s24), 0  ;;  %275 = sbr.rel (%p272_p3) target bundleno = 428 (0x1ac), region = 40 }
   0xa   : > { %p345_p6 = scmp.lt.s32.totalorder (!%p272_p3), %s1866_s25, 17  ;;  %s1876_s29 = sadd.s32 (!%p272_p3), 8, %s1866_s25  ;;  %vm672_vm3 = vcmask (!%p272_p3), 31744   ;;  %vm689_vm4 = vcmask (!%p272_p3), 64512   ;;  %vm714_vm5 = vcmask (!%p272_p3), 97280  }
   0xb   : > { %s373_s30 = sadd.s32 (!%p272_p3), 1, %s1876_s29  ;;  %p362_p7 = scmp.lt.s32.totalorder (!%p272_p3), %s1876_s29, 17 }
   0xc   : > { %p1888_p8 = scmp.lt.s32.totalorder (!%p272_p3), %s373_s30, 17  ;;  %s1804_s14 = smov (!%p272_p3), 8  }
   0xd   : > { %s1805_s17 = smov (!%p272_p3), 4   ;;  %p389_p9 = scmp.lt.s32.totalorder (!%p272_p3), %s1866_s25, 15 }
  0x10   : > { %s2225_s19 = smov (!%p343_p5, %s1790_s19), 1  ;;  %s2227_s30 = smov (!%p1888_p8, %s373_s30), 17 }
  0x11   : > { %s346_s26 = scalar_select %p345_p6, %s1866_s25, 17 }
  0x12   : > { %s1873_s27 = smul.u32 54, %s2225_s19  ;;  %s2229_s25 = smov (!%p389_p9, %s1866_s25), 15 }
  0x13   : > { %s1685_s28 = smul.u32 3, %s346_s26 }
  0x14   : > { %s1897_s12 = scalar_select %p362_p7, %s1876_s29, 17 }
  0x15   : > { %s349_s6 = sadd.s32 %s1873_s27, %s1685_s28  ;;  %s1688_s16 = smul.u32 3, %s2227_s30 }
  0x16   : > { %s1465_s7 = sshll.u32 %s349_s6, 2  ;;  %s1687_s13 = smul.u32 3, %s1897_s12 }
  0x17   : > { %s1884_s10 = scalar_lea.vmem %s2207_s0, %s1465_s7  ;;  %s1949_s18 = sadd.s32 %s1688_s16, %s1873_s27 }
  0x18   : > { %v399_v0 = vld [vmem:[%s1884_s10 + $0x4] sm:$0xf]  ;;  %v422_v1 = vld [vmem:[%s1884_s10] sm:$0xe]  ;;  %v400_v6 = vld [vmem:[%s1884_s10 + $0xc] sm:$0xf]  ;;  %s1937_s15 = sadd.s32 %s1687_s13, %s1873_s27 }
  0x19   : > { %v1731_v2 = vld [vmem:[%s1884_s10 + $0x8] ss:$0 sps:$4 sm:$0x11]   ;;  %v1490_v3 = vcombine.low %v422_v1, %v399_v0  ;;  %v398_v4 = vld [vmem:[%s1884_s10] sm:$0xf]  ;;  %s1467_s26 = sshll.u32 %s1937_s15, 2 }
  0x1a   : > { %v1899_v5 = vcombine.low %v398_v4, %v399_v0  ;;  %v401_v7 = vld [vmem:[%s1884_s10 + $0x10] sm:$0xf]  ;;  %v633_v9 = vrot.slane %v1731_v2, 1  ;;  %v503_v10 = vshll.u32 %v1731_v2, 16  ;;  %v423_v11 = vld [vmem:[%s1884_s10 + $0xc] sm:$0xe]  ;;  %s1986_s30 = scalar_lea.vmem %s2208_s1, %s1467_s26 }
  0x1b   : > { %v632_v8 = vrot.slane %v1490_v3, 1  ;;  %v1904_v12 = vcombine.low %v400_v6, %v401_v7  ;;  %v1735_v15 = vld [vmem:[%s1884_s10 + $0x14] ss:$0 sps:$4 sm:$0x11]   ;;  %v1491_v16 = vcombine.low %v423_v11, %v401_v7  ;;  %v402_v21 = vld [vmem:[%s1884_s10 + $0x18] sm:$0xf] }
  0x1c   : > { %v496_v13 = vshrl.u32 %v1899_v5, 16  ;;  %v498_v14 = vshll.u32 %v1899_v5, 16  ;;  %v505_v18 = vrot.slane %v503_v10, 1  ;;  %v636_v24 = vrot.slane %v1735_v15, 1  ;;  %v403_v26 = vld [vmem:[%s1884_s10 + $0x1c] sm:$0xf] }
  0x1d   : > { %v634_v17 = vsel %vm631_vm0, %v632_v8, %v633_v9  ;;  %v508_v19 = vshrl.u32 %v1904_v12, 16  ;;  %v510_v20 = vshll.u32 %v1904_v12, 16  ;;  %v635_v23 = vrot.slane %v1491_v16, 1  ;;  %v424_v28 = vld [vmem:[%s1884_s10 + $0x18] sm:$0xe]  ;;  %s1469_s27 = sshll.u32 %s1949_s18, 2 }
  0x1e   : > { %656 = vrot.lane.b32.xlu1 %v634_v17, %s1804_s14  ;;  %v500_v22 = vrot.slane %v498_v14, 1  ;;  %v515_v25 = vshll.u32 %v1735_v15, 16  ;;  %v1923_v29 = vcombine.low %v402_v21, %v403_v26  ;;  %v1738_v33 = vld [vmem:[%s1884_s10 + $0x20] ss:$0 sps:$4 sm:$0x11]   ;;  %v1492_v34 = vcombine.low %v424_v28, %v403_v26  ;;  %s2015_s8 = scalar_lea.vmem %s2209_s2, %s1469_s27  ;;  %s1472_s16 = sshll.u32 %s2225_s19, 5 }
  0x1f   : > { %v512_v27 = vrot.slane %v510_v20, 1  ;;  %v637_v31 = vsel %vm631_vm0, %v635_v23, %v636_v24  ;;  %v404_v35 = vld [vmem:[%s1884_s10 + $0x24] sm:$0xf]  ;;  %v405_v39 = vld [vmem:[%s1884_s10 + $0x28] sm:$0xf]  ;;  %v639_v42 = vrot.slane %v1738_v33, 1 }
  0x20   : > { %v501_v30 = vor.u32 %v500_v22, %v496_v13  ;;  %v517_v32 = vrot.slane %v515_v25, 1  ;;  %v520_v37 = vshrl.u32 %v1923_v29, 16  ;;  %v522_v38 = vshll.u32 %v1923_v29, 16  ;;  %v425_v44 = vld [vmem:[%s1884_s10 + $0x24] sm:$0xe] }
  0x21   : > { %v513_v36 = vor.u32 %v512_v27, %v508_v19  ;;  %v638_v41 = vrot.slane %v1492_v34, 1  ;;  %v527_v43 = vshll.u32 %v1738_v33, 16  ;;  %v1941_v46 = vcombine.low %v404_v35, %v405_v39  ;;  %v1741_v47 = vld [vmem:[%s1884_s10 + $0x2c] ss:$0 sps:$4 sm:$0x11]  }
  0x22   : > { %v506_v40 = vsel %vm494_vm1, %v501_v30, %v505_v18  ;;  %658 = vrot.lane.b32.xlu1 %v637_v31, %s1804_s14  ;;  %v524_v45 = vrot.slane %v522_v38, 1  ;;  %v1493_v48 = vcombine.low %v425_v44, %v405_v39  ;;  %v406_v49 = vld [vmem:[%s1884_s10 + $0x30] sm:$0xf]  ;;  %v407_v53 = vld [vmem:[%s1884_s10 + $0x34] sm:$0xf]  ;;  %v642_v56 = vrot.slane %v1741_v47, 1 }
  0x23   : > { %591 = vrot.lane.b32.xlu0 %v506_v40, %s1805_s17  ;;  %v518_v50 = vsel %vm494_vm1, %v513_v36, %v517_v32  ;;  %v640_v51 = vsel %vm631_vm0, %v638_v41, %v639_v42  ;;  %v529_v52 = vrot.slane %v527_v43, 1  ;;  %v532_v57 = vshrl.u32 %v1941_v46, 16  ;;  %v426_v58 = vld [vmem:[%s1884_s10 + $0x30] sm:$0xe]  ;;  %v408_v2 = vld [vmem:[%s1884_s10 + $0x3c] sm:$0xf] }
  0x24   : > { %v525_v54 = vor.u32 %v524_v45, %v520_v37  ;;  %v641_v55 = vrot.slane %v1493_v48, 1  ;;  %v534_v59 = vshll.u32 %v1941_v46, 16  ;;  %v539_v60 = vshll.u32 %v1741_v47, 16  ;;  %v1744_v62 = vld [vmem:[%s1884_s10 + $0x38] ss:$0 sps:$4 sm:$0x11]  }
  0x25   : > { %v1956_v61 = vcombine.low %v406_v49, %v407_v53  ;;  %v1494_v63 = vcombine.low %v426_v58, %v407_v53  ;;  %v409_v3 = vld [vmem:[%s1884_s10 + $0x40] sm:$0xf]  ;;  %v645_v8 = vrot.slane %v1744_v62, 1  ;;  %v427_v9 = vld [vmem:[%s1884_s10 + $0x3c] sm:$0xe]  ;;  %v551_v13 = vshll.u32 %v1744_v62, 16 }
  0x26   : > { %660 = vrot.lane.b32.xlu1 %v640_v51, %s1804_s14  ;;  %v530_v0 = vsel %vm494_vm1, %v525_v54, %v529_v52  ;;  %v643_v1 = vsel %vm631_vm0, %v641_v55, %v642_v56  ;;  %v536_v4 = vrot.slane %v534_v59, 1  ;;  %v541_v6 = vrot.slane %v539_v60, 1  ;;  %v1747_v15 = vld [vmem:[%s1884_s10 + $0x44] ss:$0 sps:$4 sm:$0x11]  }
  0x27   : > { %593 = vrot.lane.b32.xlu0 %v518_v50, %s1805_s17  ;;  %v644_v7 = vrot.slane %v1494_v63, 1  ;;  %v544_v10 = vshrl.u32 %v1956_v61, 16  ;;  %v546_v11 = vshll.u32 %v1956_v61, 16  ;;  %v1968_v14 = vcombine.low %v408_v2, %v409_v3  ;;  %v412_v19 = vld [vmem:[%s1884_s10 + $0x54] sm:$0xf] }
  0x28   : > { %v537_v16 = vor.u32 %v536_v4, %v532_v57  ;;  %v1495_v18 = vcombine.low %v427_v9, %v409_v3  ;;  %v413_v20 = vld [vmem:[%s1884_s10 + $0x58] sm:$0xf]  ;;  %v553_v22 = vrot.slane %v551_v13, 1  ;;  %v648_v23 = vrot.slane %v1747_v15, 1  ;;  %v410_v25 = vld [vmem:[%s1884_s10 + $0x48] sm:$0xf] }
  0x29   : > { %v646_v17 = vsel %vm631_vm0, %v644_v7, %v645_v8  ;;  %v548_v21 = vrot.slane %v546_v11, 1  ;;  %v556_v24 = vshrl.u32 %v1968_v14, 16  ;;  %v558_v28 = vshll.u32 %v1968_v14, 16  ;;  %v1750_v31 = vld [vmem:[%s1884_s10 + $0x5c] ss:$0 sps:$4 sm:$0x11]  }
  0x2a   : > { %662 = vrot.lane.b32.xlu1 %v643_v1, %s1804_s14  ;;  %v542_v26 = vsel %vm494_vm1, %v537_v16, %v541_v6  ;;  %v647_v27 = vrot.slane %v1495_v18, 1  ;;  %v563_v30 = vshll.u32 %v1747_v15, 16  ;;  %v1988_v33 = vcombine.low %v412_v19, %v413_v20  ;;  %v411_v34 = vld [vmem:[%s1884_s10 + $0x4c] sm:$0xf]  ;;  %v429_v35 = vld [vmem:[%s1884_s10 + $0x54] sm:$0xe] }
  0x2b   : > { %595 = vrot.lane.b32.xlu0 %v530_v0, %s1805_s17  ;;  %v549_v32 = vor.u32 %v548_v21, %v544_v10  ;;  %v560_v36 = vrot.slane %v558_v28, 1  ;;  %v587_v38 = vshll.u32 %v1750_v31, 16  ;;  %v1994_v39 = vld [vmem:[%s1884_s10 + $0x50] ss:$0 sps:$4 sm:$0x11]   ;;  %v2000_v43 = vcombine.low %v410_v25, %v411_v34 }
  0x2c   : > { %v565_v37 = vrot.slane %v563_v30, 1  ;;  %v649_v40 = vsel %vm631_vm0, %v647_v27, %v648_v23  ;;  %v580_v41 = vshrl.u32 %v1988_v33, 16  ;;  %v582_v42 = vshll.u32 %v1988_v33, 16  ;;  %v428_v44 = vld [vmem:[%s1884_s10 + $0x48] sm:$0xe] }
  0x2d   : > { %v723_v45 = vld [vmem:[%s1986_s30] sm:$0xf]  ;;  %v554_v47 = vsel %vm494_vm1, %v549_v32, %v553_v22  ;;  %v561_v48 = vor.u32 %v560_v36, %v556_v24  ;;  %v575_v49 = vshll.u32 %v1994_v39, 16  ;;  %v1497_v50 = vcombine.low %v429_v35, %v413_v20  ;;  %v724_v51 = vld [vmem:[%s1986_s30 + $0x4] sm:$0xf] }
  0x2e   : > { %664 = vrot.lane.b32.xlu1 %v646_v17, %s1804_s14  ;;  %v584_v52 = vrot.slane %v582_v42, 1  ;;  %v589_v53 = vrot.slane %v587_v38, 1  ;;  %v568_v54 = vshrl.u32 %v2000_v43, 16  ;;  %v570_v55 = vshll.u32 %v2000_v43, 16  ;;  %v726_v56 = vld [vmem:[%s1986_s30] sm:$0xe] }
  0x2f   : > { %597 = vrot.lane.b32.xlu0 %v542_v26, %s1805_s17  ;;  %v577_v57 = vrot.slane %v575_v49, 1  ;;  %v654_v58 = vrot.slane %v1750_v31, 1  ;;  %v1496_v59 = vcombine.low %v428_v44, %v411_v34  ;;  %v1756_v60 = vld [vmem:[%s1986_s30 + $0x8] ss:$0 sps:$4 sm:$0x11]   ;;  %v653_v0 = vrot.slane %v1497_v50, 1 }
  0x30   : > { %v585_v62 = vor.u32 %v584_v52, %v580_v41  ;;  %v572_v63 = vrot.slane %v570_v55, 1  ;;  %v2020_v1 = vcombine.low %v723_v45, %v724_v51  ;;  %v566_v2 = vsel %vm494_vm1, %v561_v48, %v565_v37  ;;  %v764_v4 = vld [vmem:[%s2015_s8] sm:$0xf]  ;;  %v765_v6 = vld [vmem:[%s2015_s8 + $0x4] sm:$0xf] }
  0x31   : > { %v1500_v3 = vcombine.low %v726_v56, %v724_v51  ;;  %v767_v10 = vld [vmem:[%s2015_s8] sm:$0xe]  ;;  %v650_v11 = vrot.slane %v1496_v59, 1  ;;  %v651_v13 = vrot.slane %v1994_v39, 1  ;;  %v743_v16 = vshll.u32 %v1756_v60, 16 }
  0x32   : > { %666 = vrot.lane.b32.xlu1 %v649_v40, %s1804_s14  ;;  %v590_v7 = vsel %vm494_vm1, %v585_v62, %v589_v53  ;;  %v573_v8 = vor.u32 %v572_v63, %v568_v54  ;;  %v738_v9 = vshll.u32 %v2020_v1, 16  ;;  %v736_v15 = vshrl.u32 %v2020_v1, 16  ;;  %v1761_v17 = vld [vmem:[%s2210_s3] sm:$0x3f]   ;;  %v1762_v22 = vld [vmem:[%s2210_s3 + $0x8] sm:$0x3f]  }
  0x33   : > { %599 = vrot.lane.b32.xlu0 %v554_v47, %s1805_s17  ;;  %v655_v18 = vsel %vm631_vm0, %v653_v0, %v654_v58  ;;  %v752_v19 = vrot.slane %v1500_v3, 1  ;;  %v753_v20 = vrot.slane %v1756_v60, 1  ;;  %v2036_v21 = vcombine.low %v764_v4, %v765_v6  ;;  %v1763_v23 = vld [vmem:[%s2210_s3 + $0x10] sm:$0x3f]   ;;  %1681 = vmatprep.subr.msk.bf16.mxu1 %vm845_vm2, %v1761_v17 }
  0x34   : > { %v578_v24 = vsel %vm494_vm1, %v573_v8, %v577_v57  ;;  %v740_v25 = vrot.slane %v738_v9, 1  ;;  %v1759_v26 = vld [vmem:[%s2015_s8 + $0x8] ss:$0 sps:$4 sm:$0x11]   ;;  %v1503_v27 = vcombine.low %v767_v10, %v765_v6  ;;  %v847_v28 = vsel %vm845_vm2, %v1761_v17, 0  ;;  %1682 = vmatprep.subr.msk.bf16.mxu0 %vm845_vm2, %v1762_v22 }
  0x35   : > { %v779_v30 = vshll.u32 %v2036_v21, 16  ;;  %1578 = vmatpush3.bf16.msra.mxu1 %v847_v28  ;;  %v652_v31 = vsel %vm631_vm0, %v650_v11, %v651_v13  ;;  %v1010_v32 = vsel %vm845_vm2, %v1762_v22, 0  ;;  %v1167_v34 = vsel %vm845_vm2, %v1763_v23, 0 }
  0x36   : > { %605 = vrot.lane.b32.xlu1 %v590_v7, %s1805_s17  ;;  %1683 = vmatprep.subr.msk.bf16.mxu1 %vm845_vm2, %v1762_v22  ;;  %v745_v35 = vrot.slane %v743_v16, 1  ;;  %v754_v36 = vsel %vm631_vm0, %v752_v19, %v753_v20  ;;  %v793_v37 = vrot.slane %v1503_v27, 1  ;;  %v794_v38 = vrot.slane %v1759_v26, 1 }
  0x37   : > { %601 = vrot.lane.b32.xlu0 %v566_v2, %s1805_s17  ;;  %1596 = vmatpush3.bf16.msra.mxu0 %v1010_v32  ;;  %v741_v39 = vor.u32 %v740_v25, %v736_v15  ;;  %v777_v40 = vshrl.u32 %v2036_v21, 16  ;;  %v781_v41 = vrot.slane %v779_v30, 1  ;;  %v784_v42 = vshll.u32 %v1759_v26, 16 }
  0x38   : > { %1684 = vmatprep.subr.msk.bf16.mxu0 %vm845_vm2, %v1763_v23  ;;  %v795_v44 = vsel %vm631_vm0, %v793_v37, %v794_v38 }
  0x39   : > { %v746_v45 = vsel %vm494_vm1, %v741_v39, %v745_v35  ;;  %v782_v47 = vor.u32 %v781_v41, %v777_v40  ;;  %v786_v48 = vrot.slane %v784_v42, 1  ;;  %v2137_v42 = vld [vmem:[%s2211_s4] ss:$0 sm:$0xff] }
  0x3a   : > { %670 = vrot.lane.b32.xlu1 %v655_v18, %s1804_s14 }
  0x3b   : > { %603 = vrot.lane.b32.xlu0 %v578_v24, %s1805_s17  ;;  %v787_v49 = vsel %vm494_vm1, %v782_v47, %v786_v48 }
  0x3e   : > { %755 = vrot.lane.b32.xlu1 %v754_v36, %s1804_s14 }
  0x3f   : > { %668 = vrot.lane.b32.xlu0 %v652_v31, %s1804_s14 }
  0x42   : > { %796 = vrot.lane.b32.xlu1 %v795_v44, %s1804_s14  ;;  %s1471_s14 = sshll.u32 %s2229_s25, 1 }
  0x43   : > { %747 = vrot.lane.b32.xlu0 %v746_v45, %s1805_s17  ;;  %s393_s26 = sadd.s32 %s1472_s16, %s1471_s14 }
  0x44   : > { %s1473_s27 = sshll.u32 %s393_s26, 3 }
  0x45   : > { %s2146_s28 = scalar_lea.vmem %s2212_s5, %s1473_s27 }
  0x47   : > { %788 = vrot.lane.b32.xlu0 %v787_v49, %s1805_s17 }
  0x90   : > { %v657_v50 = vpop.permute.xlu1 %656 }
  0x94   : > { %v659_v51 = vpop.permute.xlu1 %658 }
  0x95   : > { %v592_v52 = vpop.permute.xlu0 %591 }
  0x96   : > { %v674_v53 = vsel %vm672_vm3, %v1899_v5, %v592_v52 }
  0x97   : > { %v691_v54 = vsel %vm689_vm4, %v674_v53, %v657_v50 }
  0x98   : > { %715 = vst.msk [vmem:[#allocation2] sm:$0xff] %vm714_vm5, %v691_v54  ;;  %v661_v55 = vpop.permute.xlu1 %660 }
  0x99   : > { %v594_v56 = vpop.permute.xlu0 %593 }
  0x9a   : > { %v676_v57 = vsel %vm672_vm3, %v1904_v12, %v594_v56 }
  0x9b   : > { %v694_v58 = vsel %vm689_vm4, %v676_v57, %v659_v51 }
  0x9c   : > { %716 = vst.msk [vmem:[#allocation2 + $0x8] sm:$0xff] %vm714_vm5, %v694_v58  ;;  %v663_v59 = vpop.permute.xlu1 %662 }
  0x9d   : > { %v596_v60 = vpop.permute.xlu0 %595 }
  0x9e   : > { %v678_v62 = vsel %vm672_vm3, %v1923_v29, %v596_v60 }
  0x9f   : > { %v697_v5 = vsel %vm689_vm4, %v678_v62, %v661_v55  ;;  %v806_v63 = vld [vmem:[#allocation2] sm:$0xff] }
  0xa0   : > { %717 = vst.msk [vmem:[#allocation2 + $0x10] sm:$0xff] %vm714_vm5, %v697_v5  ;;  %1579 = vmatprep.mubr.msk.bf16.mxu1 %vm714_vm5, %v806_v63  ;;  %v665_v0 = vpop.permute.xlu1 %664 }
  0xa1   : > { %v598_v2 = vpop.permute.xlu0 %597 }
  0xa2   : > { %v680_v12 = vsel %vm672_vm3, %v1941_v46, %v598_v2 }
  0xa3   : > { %v700_v3 = vsel %vm689_vm4, %v680_v12, %v663_v59  ;;  %v807_v4 = vld [vmem:[#allocation2 + $0x8] sm:$0xff] }
  0xa4   : > { %718 = vst.msk [vmem:[#allocation2 + $0x18] sm:$0xff] %vm714_vm5, %v700_v3  ;;  %1580 = vmatmul.mubr.msk.bf16.vlgmr.msra.gmra.mrb[0].mxu1 %vm714_vm5, %v807_v4  ;;  %1597 = vmatprep.mubr.msk.bf16.mxu0 %vm714_vm5, %v807_v4  ;;  %v667_v29 = vpop.permute.xlu1 %666 }
  0xa5   : > { %v600_v6 = vpop.permute.xlu0 %599  ;;  %1632 = vmatpush3.bf16.msra.mxu1 %v1010_v32 }
  0xa6   : > { %v682_v7 = vsel %vm672_vm3, %v1956_v61, %v600_v6 }
  0xa7   : > { %v703_v8 = vsel %vm689_vm4, %v682_v7, %v665_v0  ;;  %v808_v9 = vld [vmem:[#allocation2 + $0x10] sm:$0xff] }
  0xa8   : > { %719 = vst.msk [vmem:[#allocation2 + $0x20] sm:$0xff] %vm714_vm5, %v703_v8  ;;  %1583 = vmatprep.mubr.msk.bf16.mxu1 %vm714_vm5, %v808_v9  ;;  %1598 = vmatmul.mubr.msk.bf16.vlgmr.msra.gmra.mrb[0].mxu0 %vm714_vm5, %v808_v9  ;;  %v606_v46 = vpop.permute.xlu1 %605 }
  0xa9   : > { %1614 = vmatpush3.bf16.msra.mxu0 %v1167_v34  ;;  %v602_v10 = vpop.permute.xlu0 %601  ;;  %v688_v13 = vsel %vm672_vm3, %v1988_v33, %v606_v46 }
  0xaa   : > { %v684_v11 = vsel %vm672_vm3, %v1968_v14, %v602_v10 }
  0xab   : > { %v706_v61 = vsel %vm689_vm4, %v684_v11, %v667_v29  ;;  %v809_v15 = vld [vmem:[#allocation2 + $0x18] sm:$0xff] }
  0xac   : > { %720 = vst.msk [vmem:[#allocation2 + $0x28] sm:$0xff] %vm714_vm5, %v706_v61  ;;  %1584 = vmatmul.mubr.msk.bf16.gmra.mrb[4].mxu1 %vm714_vm5, %v809_v15  ;;  %1601 = vmatprep.mubr.msk.bf16.mxu0 %vm714_vm5, %v809_v15  ;;  %v671_v16 = vpop.permute.xlu1 %670 }
  0xad   : > { %v604_v17 = vpop.permute.xlu0 %603  ;;  %v712_v18 = vsel %vm689_vm4, %v688_v13, %v671_v16 }
  0xae   : > { %722 = vst.msk [vmem:[#allocation2 + $0x38] sm:$0xff] %vm714_vm5, %v712_v18  ;;  %v686_v14 = vsel %vm672_vm3, %v2000_v43, %v604_v17 }
  0xaf   : > { %v810_v19 = vld [vmem:[#allocation2 + $0x20] sm:$0xff] }
  0xb0   : > { %1587 = vmatprep.mubr.msk.bf16.mxu1 %vm714_vm5, %v810_v19  ;;  %1602 = vmatmul.mubr.msk.bf16.gmra.mrb[4].mxu0 %vm714_vm5, %v810_v19  ;;  %v756_v22 = vpop.permute.xlu1 %755 }
  0xb1   : > { %1615 = vmatprep.mubr.msk.bf16.mxu0 %vm714_vm5, %v808_v9  ;;  %v669_v33 = vpop.permute.xlu0 %668 }
  0xb2   : > { %v709_v20 = vsel %vm689_vm4, %v686_v14, %v669_v33 }
  0xb3   : > { %721 = vst.msk [vmem:[#allocation2 + $0x30] sm:$0xff] %vm714_vm5, %v709_v20  ;;  %v811_v23 = vld [vmem:[#allocation2 + $0x28] sm:$0xff] }
  0xb4   : > { %1588 = vmatmul.mubr.msk.bf16.gmra.mrb[8].mxu1 %vm714_vm5, %v811_v23  ;;  %v797_v26 = vpop.permute.xlu1 %796 }
  0xb5   : > { %v748_v24 = vpop.permute.xlu0 %747  ;;  %v813_v27 = vld [vmem:[#allocation2 + $0x38] sm:$0xff] }
  0xb6   : > { %v758_v43 = vsel %vm672_vm3, %v2020_v1, %v748_v24 }
  0xb7   : > { %v760_v25 = vsel %vm689_vm4, %v758_v43, %v756_v22 }
  0xb8   : > { %1616 = vmatmul.mubr.msk.bf16.vlgmr.msra.gmra.mrb[0].mxu0 %vm714_vm5, %v809_v15  ;;  %763 = vst.msk [vmem:[#allocation2 + $0x40] sm:$0xff] %vm714_vm5, %v760_v25 }
  0xb9   : > { %1619 = vmatprep.mubr.msk.bf16.mxu0 %vm714_vm5, %v810_v19  ;;  %v789_v28 = vpop.permute.xlu0 %788 }
  0xba   : > { %v812_v30 = vld [vmem:[#allocation2 + $0x30] sm:$0xff]  ;;  %v799_v31 = vsel %vm672_vm3, %v2036_v21, %v789_v28 }
  0xbb   : > { %1591 = vmatprep.mubr.msk.bf16.mxu1 %vm714_vm5, %v812_v30  ;;  %v801_v32 = vsel %vm689_vm4, %v799_v31, %v797_v26 }
  0xbc   : > { %1592 = vmatmul.mubr.msk.bf16.gmra.mrb[12].mxu1 %vm714_vm5, %v813_v27  ;;  %804 = vst.msk [vmem:[#allocation2 + $0x48] sm:$0xff] %vm714_vm5, %v801_v32 }
  0xbd   : > { %1605 = vmatprep.mubr.msk.bf16.mxu1 %vm714_vm5, %v811_v23 }
  0xbf   : > { %v976_v1 = vld [vmem:[#allocation2 + $0x40] sm:$0xff] }
  0xc0   : > { %1620 = vmatmul.mubr.msk.bf16.gmra.mrb[4].mxu0 %vm714_vm5, %v811_v23 }
  0xc1   : > { %1623 = vmatprep.mubr.msk.bf16.mxu0 %vm714_vm5, %v812_v30 }
  0xc3   : > { %v1133_v21 = vld [vmem:[#allocation2 + $0x48] sm:$0xff] }
  0xc4   : > { %1606 = vmatmul.mubr.msk.bf16.vlgmr.msra.gmra.mrb[8].mxu1 %vm714_vm5, %v812_v30 }
  0xc5   : > { %1609 = vmatprep.mubr.msk.bf16.mxu1 %vm714_vm5, %v813_v27 }
  0xc8   : > { %1624 = vmatmul.mubr.msk.bf16.gmra.mrb[8].mxu0 %vm714_vm5, %v813_v27 }
  0xc9   : > { %1627 = vmatprep.mubr.msk.bf16.mxu0 %vm714_vm5, %v976_v1 }
  0xcc   : > { %1610 = vmatmul.mubr.msk.bf16.gmra.mrb[12].mxu1 %vm714_vm5, %v976_v1 }
  0xd0   : > { %1628 = vmatmul.mubr.msk.bf16.gmra.mrb[12].mxu0 %vm714_vm5, %v1133_v21 }
 0x177   : > { %v1581_v34 = vpop.f32.mrb[0].mxu1 }
 0x178   : > { %v883_v35 = vpop.f32.mrb[1].mxu1  ;;  %v954_v44 = vadd.f32 %v1581_v34, %v2137_v42 }
 0x179   : > { %v1582_v36 = vpop.f32.mrb[2].mxu1  ;;  %v952_v45 = vadd.f32 %v2137_v42, %v883_v35 }
 0x17a   : > { %v886_v37 = vpop.f32.mrb[3].mxu1  ;;  %v955_v48 = vadd.f32 %v1582_v36, %v2137_v42 }
 0x17b   : > { %v953_v51 = vadd.f32 %v2137_v42, %v886_v37 }
 0x17f   : > { %v1585_v38 = vpop.f32.mrb[4].mxu1 }
 0x180   : > { %v899_v39 = vpop.f32.mrb[5].mxu1  ;;  %v958_v62 = vadd.f32 %v1585_v38, %v2137_v42 }
 0x181   : > { %v1586_v40 = vpop.f32.mrb[6].mxu1  ;;  %v956_v5 = vadd.f32 %v2137_v42, %v899_v39 }
 0x182   : > { %v902_v41 = vpop.f32.mrb[7].mxu1  ;;  %v959_v0 = vadd.f32 %v1586_v40, %v2137_v42 }
 0x183   : > { %v957_v3 = vadd.f32 %v2137_v42, %v902_v41 }
 0x18b   : > { %v1617_v47 = vpop.f32.mrb[0].mxu0 }
 0x18c   : > { %v1634_v49 = vadd.f32 %v1617_v47, %v954_v44  ;;  %v1203_v50 = vpop.f32.mrb[1].mxu0 }
 0x18d   : > { %v1636_v52 = vadd.f32 %v1203_v50, %v952_v45  ;;  %v1618_v53 = vpop.f32.mrb[2].mxu0 }
 0x18e   : > { %v1284_v54 = vmax.f32 %v1634_v49, 0.0  ;;  %v1638_v55 = vadd.f32 %v1618_v53, %v955_v48  ;;  %v1206_v56 = vpop.f32.mrb[3].mxu0 }
 0x18f   : > { %v1282_v57 = vmax.f32 %v1636_v52, 0.0  ;;  %v1640_v58 = vadd.f32 %v1206_v56, %v953_v51 }
 0x190   : > { %1300 = vst.msk [vmem:[%s2146_s28 + $0x10] sm:$0xff] %vm689_vm4, %v1284_v54  ;;  %v1285_v59 = vmax.f32 %v1638_v55, 0.0 }
 0x191   : > { %1298 = vst.msk [vmem:[%s2146_s28] sm:$0xff] %vm689_vm4, %v1282_v57  ;;  %v1283_v60 = vmax.f32 %v1640_v58, 0.0 }
 0x192   : > { %1301 = vst.msk [vmem:[%s2146_s28 + $0x18] sm:$0xff] %vm689_vm4, %v1285_v59 }
 0x193   : > { %1299 = vst.msk [vmem:[%s2146_s28 + $0x8] sm:$0xff] %vm689_vm4, %v1283_v60  ;;  %v1621_v63 = vpop.f32.mrb[4].mxu0 }
 0x194   : > { %v1642_v2 = vadd.f32 %v1621_v63, %v958_v62  ;;  %v1219_v12 = vpop.f32.mrb[5].mxu0 }
 0x195   : > { %v1644_v4 = vadd.f32 %v1219_v12, %v956_v5  ;;  %v1622_v29 = vpop.f32.mrb[6].mxu0 }
 0x196   : > { %v1288_v6 = vmax.f32 %v1642_v2, 0.0  ;;  %v1646_v7 = vadd.f32 %v1622_v29, %v959_v0  ;;  %v1222_v8 = vpop.f32.mrb[7].mxu0 }
 0x197   : > { %v1286_v9 = vmax.f32 %v1644_v4, 0.0  ;;  %v1648_v46 = vadd.f32 %v1222_v8, %v957_v3  ;;  %v1607_v10 = vpop.f32.mrb[8].mxu1 }
 0x198   : > { %1304 = vst.msk [vmem:[%s2146_s28 + $0x30] sm:$0xff] %vm689_vm4, %v1288_v6  ;;  %v1289_v11 = vmax.f32 %v1646_v7, 0.0  ;;  %v1078_v13 = vpop.f32.mrb[9].mxu1  ;;  %v1649_v16 = vadd.f32 %v1607_v10, %v2137_v42 }
 0x199   : > { %1302 = vst.msk [vmem:[%s2146_s28 + $0x20] sm:$0xff] %vm689_vm4, %v1286_v9  ;;  %v1287_v61 = vmax.f32 %v1648_v46, 0.0  ;;  %v1608_v15 = vpop.f32.mrb[10].mxu1  ;;  %v1651_v18 = vadd.f32 %v2137_v42, %v1078_v13 }
 0x19a   : > { %1305 = vst.msk [vmem:[%s2146_s28 + $0x38] sm:$0xff] %vm689_vm4, %v1289_v11  ;;  %v1081_v17 = vpop.f32.mrb[11].mxu1  ;;  %v1653_v19 = vadd.f32 %v1608_v15, %v2137_v42 }
 0x19b   : > { %1303 = vst.msk [vmem:[%s2146_s28 + $0x28] sm:$0xff] %vm689_vm4, %v1287_v61  ;;  %v1625_v14 = vpop.f32.mrb[8].mxu0  ;;  %v1655_v22 = vadd.f32 %v2137_v42, %v1081_v17 }
 0x19c   : > { %v1650_v33 = vadd.f32 %v1649_v16, %v1625_v14  ;;  %v1235_v20 = vpop.f32.mrb[9].mxu0 }
 0x19d   : > { %v1652_v23 = vadd.f32 %v1651_v18, %v1235_v20  ;;  %v1626_v24 = vpop.f32.mrb[10].mxu0 }
 0x19e   : > { %v1292_v43 = vmax.f32 %v1650_v33, 0.0  ;;  %v1654_v25 = vadd.f32 %v1653_v19, %v1626_v24  ;;  %v1238_v26 = vpop.f32.mrb[11].mxu0 }
 0x19f   : > { %v1290_v27 = vmax.f32 %v1652_v23, 0.0  ;;  %v1656_v28 = vadd.f32 %v1655_v22, %v1238_v26  ;;  %v1611_v30 = vpop.f32.mrb[12].mxu1 }
 0x1a0   : > { %1308 = vst.msk [vmem:[%s2146_s28 + $0x50] sm:$0xff] %vm689_vm4, %v1292_v43  ;;  %v1293_v31 = vmax.f32 %v1654_v25, 0.0  ;;  %v1094_v32 = vpop.f32.mrb[13].mxu1  ;;  %v1657_v34 = vadd.f32 %v1611_v30, %v2137_v42 }
 0x1a1   : > { %1306 = vst.msk [vmem:[%s2146_s28 + $0x40] sm:$0xff] %vm689_vm4, %v1290_v27  ;;  %v1291_v1 = vmax.f32 %v1656_v28, 0.0  ;;  %v1612_v21 = vpop.f32.mrb[14].mxu1  ;;  %v1659_v36 = vadd.f32 %v2137_v42, %v1094_v32 }
 0x1a2   : > { %1309 = vst.msk [vmem:[%s2146_s28 + $0x58] sm:$0xff] %vm689_vm4, %v1293_v31  ;;  %v1097_v35 = vpop.f32.mrb[15].mxu1  ;;  %v1661_v38 = vadd.f32 %v1612_v21, %v2137_v42 }
 0x1a3   : > { %1307 = vst.msk [vmem:[%s2146_s28 + $0x48] sm:$0xff] %vm689_vm4, %v1291_v1  ;;  %v1629_v37 = vpop.f32.mrb[12].mxu0  ;;  %v1663_v41 = vadd.f32 %v2137_v42, %v1097_v35 }
 0x1a4   : > { %v1658_v39 = vadd.f32 %v1657_v34, %v1629_v37  ;;  %v1251_v40 = vpop.f32.mrb[13].mxu0 }
 0x1a5   : > { %v1660_v44 = vadd.f32 %v1659_v36, %v1251_v40  ;;  %v1630_v45 = vpop.f32.mrb[14].mxu0 }
 0x1a6   : > { %v1296_v47 = vmax.f32 %v1658_v39, 0.0  ;;  %v1662_v48 = vadd.f32 %v1661_v38, %v1630_v45  ;;  %v1254_v49 = vpop.f32.mrb[15].mxu0 }
 0x1a7   : > { %v1294_v50 = vmax.f32 %v1660_v44, 0.0  ;;  %v1664_v51 = vadd.f32 %v1663_v41, %v1254_v49 }
 0x1a8   : > { %1312 = vst.msk [vmem:[%s2146_s28 + $0x70] sm:$0xff] %vm689_vm4, %v1296_v47  ;;  %v1297_v52 = vmax.f32 %v1662_v48, 0.0 }
 0x1a9   : > { %1310 = vst.msk [vmem:[%s2146_s28 + $0x60] sm:$0xff] %vm689_vm4, %v1294_v50  ;;  %v1295_v53 = vmax.f32 %v1664_v51, 0.0 }
 0x1aa   : > { %1313 = vst.msk [vmem:[%s2146_s28 + $0x78] sm:$0xff] %vm689_vm4, %v1297_v52 }
 0x1ab   : > { %1311 = vst.msk [vmem:[%s2146_s28 + $0x68] sm:$0xff] %vm689_vm4, %v1295_v53 }
 0x1ac PF: > { %s15_s22 = sadd.s32 1, %s1802_s22   ;;  %s2214_s18 = smov %s1794_s20 }
 0x1ad   : > { %p12_p10 = scmp.ge.s32.totalorder %s15_s22, 6   ;;  %s2215_s19 = smov %s1798_s21 }
 0x1ae   : > { %s2216_s20 = smov %s2219_s23  ;;  %s2217_s21 = smov %s2223_s24 }
 0x1af   :  { %14 = sbr.rel (!%p12_p10) target bundleno = 3 (0x3), region = 82 }

</bundles_post_ra>
